<compile_context>
chip_gen: v6e
topology: v6e:2x2x1
jax: 0.10.0
libtpu: 0.0.40
codegen_flags: <defaults>
</compile_context>

<pallas_src>
import math

import jax
import jax.numpy as jnp
from jax.experimental import pallas as pl
from jax.experimental.pallas import tpu as pltpu


# ----------------------------------------------------------------------------
# Pallas kernel: one grid step per (batch, row-tile).
# ----------------------------------------------------------------------------
def _node_feature_kernel(bb_ref, masks_ref, tvec_ref, wf_ref, const_ref, o_ref):
    masks = masks_ref[...]                       # (TILE_N, 2) f32 = [res_mask, diffuse_mask]
    rm = masks[:, 0:1]                           # (TILE_N, 1)
    dm = masks[:, 1:2]                           # (TILE_N, 1)

    # Mask on the narrow input axis in the input's native dtype, then one
    # fused MXU matmul (f32 accumulate).
    bb = bb_ref[...]
    x = (bb * rm.astype(bb.dtype)).astype(wf_ref.dtype)

    # Fused epilogue: single pass over the (TILE_N, c_s) tile.
    #   + dm * wdm-row   (diffuse-mask column of the linear layer)
    #   + rm * tvec      (res_mask-gated per-batch time contribution)
    #   + bias
    o_ref[...] = (
        jnp.dot(x, wf_ref[...], preferred_element_type=jnp.float32)
        + dm * const_ref[0:1, :]
        + rm * tvec_ref[...]
        + const_ref[1:2, :]
    ).astype(o_ref.dtype)


# ----------------------------------------------------------------------------
# Glue: sinusoidal time embedding (tiny, per-batch) + pallas_call wrapper.
# ----------------------------------------------------------------------------
def get_time_embedding(timesteps, embedding_dim, max_positions=2056):
    """Sinusoidal timestep embedding (matches the PyTorch get_time_embedding)."""
    assert timesteps.ndim == 1
    timesteps = timesteps * max_positions
    half_dim = embedding_dim // 2
    emb = math.log(max_positions) / (half_dim - 1)
    emb = jnp.exp(jnp.arange(half_dim, dtype=jnp.float32) * -emb)
    emb = timesteps.astype(jnp.float32)[:, None] * emb[None, :]
    emb = jnp.concatenate([jnp.sin(emb), jnp.cos(emb)], axis=1)
    if embedding_dim % 2 == 1:
        emb = jnp.pad(emb, ((0, 0), (0, 1)))
    return emb


def node_feature_net(so3_t, r3_t, res_mask, diffuse_mask, bb_emb, params, *,
                     c_timestep_emb, matmul_dtype=jnp.float32, out_dtype=None,
                     tile_n=None, batch_core_parallel=False):
    B, N = res_mask.shape
    c_bb_input = bb_emb.shape[-1]
    w_bb = params["w_bb"]            # (c_bb_input, c_bb_emb)
    w_lin = params["w_lin"]          # (embed_size, c_s)
    b_lin = params["b_lin"]          # (c_s,)
    c_bb_emb = w_bb.shape[1]
    c_s = w_lin.shape[1]
    if out_dtype is None:
        out_dtype = bb_emb.dtype     # match the module's native output dtype

    # Split the linear weight by concat order [bb_emb | diffuse_mask | t_so3 | t_r3].
    w1 = w_lin[:c_bb_emb]                                            # (c_bb_emb, c_s)
    wdm = w_lin[c_bb_emb:c_bb_emb + 1]                               # (1, c_s)
    w2 = w_lin[c_bb_emb + 1:c_bb_emb + 1 + c_timestep_emb]           # (c_t, c_s)
    w3 = w_lin[c_bb_emb + 1 + c_timestep_emb:]                       # (c_t, c_s)

    # Algebraic fusion of the two chained matmuls (rm scales rows, so it commutes).
    w_fused = (w_bb @ w1).astype(matmul_dtype)                       # (c_bb_input, c_s)

    # Per-batch time contribution computed once in plain XLA (M=1 matmuls are
    # MXU-hostile inside the kernel).
    t_so3 = get_time_embedding(so3_t[:, 0], c_timestep_emb)          # (B, c_t)
    t_r3 = get_time_embedding(r3_t[:, 0], c_timestep_emb)            # (B, c_t)
    tvec = (t_so3 @ w2 + t_r3 @ w3)[:, None, :].astype(jnp.float32)  # (B, 1, c_s)

    # [wdm-row ; bias-row] — one tiny resident constant block.
    const_rows = jnp.concatenate([wdm, b_lin[None, :]], axis=0).astype(jnp.float32)

    # Merge the two masks into a single input stream (f32 VPU math on all chips).
    masks = jnp.stack([res_mask, diffuse_mask], axis=-1).astype(jnp.float32)  # (B, N, 2)

    # Row tiling: cap 2048 (per-step Pallas overhead ~0.35 us amortized; blocks
    # stay a few MiB even on v7x). Sub-N user tiles are rounded to a multiple
    # of 16 (sublane-aligned for f32 and bf16 packing).
    if tile_n is None:
        tile_n = min(N, 2048)
    if tile_n < N:
        tile_n = max(16, (tile_n // 16) * 16)
    else:
        tile_n = N
    n_tiles = pl.cdiv(N, tile_n)

    # VMEM budget: double-buffered streamed blocks + resident constants, with
    # generous headroom (clamped to v7x's 64 MiB physical VMEM).
    isz = lambda dt: jnp.dtype(dt).itemsize
    blk_bytes = (
        2 * tile_n * c_bb_input * isz(bb_emb.dtype)     # bb_emb tiles
        + 2 * tile_n * 2 * 4                            # mask tiles
        + 2 * 1 * c_s * 4                               # tvec
        + 2 * c_bb_input * c_s * isz(matmul_dtype)      # fused weight
        + 2 * 2 * c_s * 4                               # [wdm ; bias]
        + 2 * tile_n * c_s * isz(out_dtype)             # output tiles
    )
    vmem_limit = int(min(64 << 20, max(32 << 20, 4 * blk_bytes)))

    # v7x: the two TensorCores only split the grid with CORE_PARALLEL; plain
    # "parallel" has near-zero codegen effect.  Off by default (single-TC
    # chips / safe path).  TODO(synk): confirm 2-TC split in an xprof trace.
    batch_sem = pltpu.CORE_PARALLEL if batch_core_parallel else "parallel"

    out = pl.pallas_call(
        _node_feature_kernel,
        out_shape=jax.ShapeDtypeStruct((B, N, c_s), out_dtype),
        grid_spec=pltpu.PrefetchScalarGridSpec(
            num_scalar_prefetch=0,
            grid=(B, n_tiles),
            in_specs=[
                pl.BlockSpec((None, tile_n, c_bb_input), lambda b, t: (b, t, 0)),  # bb_emb
                pl.BlockSpec((None, tile_n, 2), lambda b, t: (b, t, 0)),           # [rm, dm]
                pl.BlockSpec((None, 1, c_s), lambda b, t: (b, 0, 0)),              # tvec (per batch)
                pl.BlockSpec((c_bb_input, c_s), lambda b, t: (0, 0)),              # fused weight
                pl.BlockSpec((2, c_s), lambda b, t: (0, 0)),                       # [wdm ; bias]
            ],
            out_specs=pl.BlockSpec((None, tile_n, c_s), lambda b, t: (b, t, 0)),
        ),
        compiler_params=pltpu.CompilerParams(
            dimension_semantics=(batch_sem, "parallel"),
            vmem_limit_bytes=vmem_limit),
    )(bb_emb, masks, tvec, w_fused, const_rows)
    return out


# Pure-JAX reference (concat-then-linear, mirrors the PyTorch forward).
def node_feature_net_ref(so3_t, r3_t, res_mask, diffuse_mask, bb_emb, params, *,
                         c_timestep_emb):
    B, N = res_mask.shape
    bb = bb_emb @ params["w_bb"]
    bb = bb * res_mask[..., None]
    t_so3 = jnp.repeat(get_time_embedding(so3_t[:, 0], c_timestep_emb)[:, None, :],
                       N, axis=1) * res_mask[..., None]
    t_r3 = jnp.repeat(get_time_embedding(r3_t[:, 0], c_timestep_emb)[:, None, :],
                      N, axis=1) * res_mask[..., None]
    feats = jnp.concatenate([bb, diffuse_mask[..., None], t_so3, t_r3], axis=-1)
    return feats @ params["w_lin"] + params["b_lin"]


def _make_case(key, *, B, N, c_bb_input, c_bb_emb, c_s, c_timestep_emb):
    embed_size = c_bb_emb + 2 * c_timestep_emb + 1
    k1, k2, k3, k4, k5, k6, k7, k8 = jax.random.split(key, 8)
    params = {
        "w_bb": 0.02 * jax.random.normal(k1, (c_bb_input, c_bb_emb), jnp.float32),
        "w_lin": 0.02 * jax.random.normal(k2, (embed_size, c_s), jnp.float32),
        "b_lin": 0.01 * jax.random.normal(k3, (c_s,), jnp.float32),
    }
    so3_t = jax.random.uniform(k4, (B, 1), jnp.float32)
    r3_t = jax.random.uniform(k5, (B, 1), jnp.float32)
    res_mask = (jax.random.uniform(k6, (B, N)) > 0.2).astype(jnp.float32)
    diffuse_mask = (jax.random.uniform(k7, (B, N)) > 0.5).astype(jnp.float32)
    bb_emb = jax.random.normal(k8, (B, N, c_bb_input), jnp.float32)
    return params, (so3_t, r3_t, res_mask, diffuse_mask, bb_emb)


if __name__ == "__main__":
    root = jax.random.PRNGKey(0)
    k_a, k_b, k_c = jax.random.split(root, 3)

    # Case 1: lane-aligned c_s (=128), f32 everywhere — exact vs reference.
    params, inputs = _make_case(k_a, B=2, N=16, c_bb_input=16, c_bb_emb=32,
                                c_s=128, c_timestep_emb=16)
    ref = node_feature_net_ref(*inputs, params, c_timestep_emb=16)
    out = jax.block_until_ready(
        node_feature_net(*inputs, params, c_timestep_emb=16))
    assert out.shape == ref.shape and out.dtype == ref.dtype
    assert jnp.allclose(out, ref, atol=1e-5, rtol=1e-4), "f32 mismatch vs reference"

    # Case 1b: bf16 matmul operand + bf16 output (the mem-bound fast path).
    out_bf16 = jax.block_until_ready(
        node_feature_net(*inputs, params, c_timestep_emb=16,
                         matmul_dtype=jnp.bfloat16, out_dtype=jnp.bfloat16))
    assert out_bf16.dtype == jnp.bfloat16
    assert jnp.allclose(out_bf16.astype(jnp.float32), ref, atol=1e-2, rtol=3e-2), \
        "bf16 mismatch vs reference"

    # Case 2: c_s not a multiple of 128 — output written at native width,
    # no pad / no post-kernel slice.
    params2, inputs2 = _make_case(k_b, B=2, N=16, c_bb_input=16, c_bb_emb=32,
                                  c_s=96, c_timestep_emb=16)
    ref2 = node_feature_net_ref(*inputs2, params2, c_timestep_emb=16)
    out2 = jax.block_until_ready(
        node_feature_net(*inputs2, params2, c_timestep_emb=16))
    assert out2.shape == ref2.shape
    assert jnp.allclose(out2, ref2, atol=1e-5, rtol=1e-4), "unaligned-c_s mismatch"

    # Case 3: multi-tile grid with a partial final row tile (N=40, tile_n=16).
    params3, inputs3 = _make_case(k_c, B=2, N=40, c_bb_input=16, c_bb_emb=32,
                                  c_s=128, c_timestep_emb=16)
    ref3 = node_feature_net_ref(*inputs3, params3, c_timestep_emb=16)
    out3 = jax.block_until_ready(
        node_feature_net(*inputs3, params3, c_timestep_emb=16, tile_n=16))
    assert out3.shape == ref3.shape
    assert jnp.allclose(out3, ref3, atol=1e-5, rtol=1e-4), "tiled/partial-block mismatch"

    print("KERNEL_OK")
</pallas_src>

<mosaic_0001>
module attributes {stable_mosaic.version = 11 : i64} {
  func.func @_node_feature_kernel(%arg0: i32, %arg1: i32, %arg2: memref<1x16x16xf32, #tpu.memory_space<vmem>>, %arg3: memref<1x16x2xf32, #tpu.memory_space<vmem>>, %arg4: memref<1x1x128xf32, #tpu.memory_space<vmem>>, %arg5: memref<16x128xf32, #tpu.memory_space<vmem>>, %arg6: memref<2x128xf32, #tpu.memory_space<vmem>>, %arg7: memref<1x16x128xf32, #tpu.memory_space<vmem>>) attributes {dimension_semantics = [#tpu.dimension_semantics<parallel>, #tpu.dimension_semantics<parallel>], iteration_bounds = array<i64: 2, 1>, scalar_prefetch = 0 : i64, scratch_operands = 0 : i64, tpu.core_type = #tpu.core_type<tc>, window_params = [{transform_indices = @transform_0, window_bounds = array<i64: 1, 16, 16>}, {transform_indices = @transform_1, window_bounds = array<i64: 1, 16, 2>}, {transform_indices = @transform_2, window_bounds = array<i64: 1, 1, 128>}, {pipeline_mode = #tpu.pipeline_mode<synchronous>, transform_indices = @transform_3, window_bounds = array<i64: 16, 128>}, {pipeline_mode = #tpu.pipeline_mode<synchronous>, transform_indices = @transform_4, window_bounds = array<i64: 2, 128>}, {transform_indices = @transform_5, window_bounds = array<i64: 1, 16, 128>}]} {
    %c0 = arith.constant 0 : index
    %c0_0 = arith.constant 0 : index
    %c0_1 = arith.constant 0 : index
    %0 = vector.load %arg3[%c0, %c0_0, %c0_1] : memref<1x16x2xf32, #tpu.memory_space<vmem>>, vector<1x16x2xf32>
    %1 = vector.shape_cast %0 : vector<1x16x2xf32> to vector<16x2xf32>
    %2 = vector.extract_strided_slice %1 {offsets = [0, 0], sizes = [16, 1], strides = [1, 1]} : vector<16x2xf32> to vector<16x1xf32>
    %3 = vector.extract_strided_slice %1 {offsets = [0, 1], sizes = [16, 1], strides = [1, 1]} : vector<16x2xf32> to vector<16x1xf32>
    %c0_2 = arith.constant 0 : index
    %c0_3 = arith.constant 0 : index
    %c0_4 = arith.constant 0 : index
    %4 = vector.load %arg2[%c0_2, %c0_3, %c0_4] : memref<1x16x16xf32, #tpu.memory_space<vmem>>, vector<1x16x16xf32>
    %5 = vector.shape_cast %4 : vector<1x16x16xf32> to vector<16x16xf32>
    %6 = vector.broadcast %2 : vector<16x1xf32> to vector<16x16xf32>
    %7 = arith.mulf %5, %6 : vector<16x16xf32>
    %c0_5 = arith.constant 0 : index
    %c0_6 = arith.constant 0 : index
    %8 = vector.load %arg5[%c0_5, %c0_6] : memref<16x128xf32, #tpu.memory_space<vmem>>, vector<16x128xf32>
    %cst = arith.constant dense<0.000000e+00> : vector<16x128xf32>
    %9 = tpu.matmul %7, %8, %cst {dimension_numbers = #tpu.dot_dimension_numbers<[1], [0], [0], [1], [0, 0, 1, 1], [], []>} : vector<16x16xf32>, vector<16x128xf32>, vector<16x128xf32> -> vector<16x128xf32>
    %c0_7 = arith.constant 0 : index
    %c0_8 = arith.constant 0 : index
    %10 = vector.load %arg6[%c0_7, %c0_8] : memref<2x128xf32, #tpu.memory_space<vmem>>, vector<1x128xf32>
    %11 = vector.broadcast %3 : vector<16x1xf32> to vector<16x128xf32>
    %12 = vector.broadcast %10 : vector<1x128xf32> to vector<16x128xf32>
    %13 = arith.mulf %11, %12 : vector<16x128xf32>
    %14 = arith.addf %9, %13 : vector<16x128xf32>
    %c0_9 = arith.constant 0 : index
    %c0_10 = arith.constant 0 : index
    %c0_11 = arith.constant 0 : index
    %15 = vector.load %arg4[%c0_9, %c0_10, %c0_11] : memref<1x1x128xf32, #tpu.memory_space<vmem>>, vector<1x1x128xf32>
    %16 = vector.shape_cast %15 : vector<1x1x128xf32> to vector<1x128xf32>
    %17 = vector.broadcast %2 : vector<16x1xf32> to vector<16x128xf32>
    %18 = vector.broadcast %16 : vector<1x128xf32> to vector<16x128xf32>
    %19 = arith.mulf %17, %18 : vector<16x128xf32>
    %20 = arith.addf %14, %19 : vector<16x128xf32>
    %c1 = arith.constant 1 : index
    %c0_12 = arith.constant 0 : index
    %21 = vector.load %arg6[%c1, %c0_12] : memref<2x128xf32, #tpu.memory_space<vmem>>, vector<1x128xf32>
    %22 = vector.broadcast %21 : vector<1x128xf32> to vector<16x128xf32>
    %23 = arith.addf %20, %22 : vector<16x128xf32>
    %c0_13 = arith.constant 0 : index
    %c0_14 = arith.constant 0 : index
    %c0_15 = arith.constant 0 : index
    %24 = vector.load %arg7[%c0_13, %c0_14, %c0_15] : memref<1x16x128xf32, #tpu.memory_space<vmem>>, vector<1x16x128xf32>
    %25 = vector.shape_cast %24 : vector<1x16x128xf32> to vector<16x128xf32>
    %26 = vector.shape_cast %23 : vector<16x128xf32> to vector<1x16x128xf32>
    tpu.vector_store %arg7[%c0_13, %c0_14, %c0_15], %26 {strides = array<i32>} : memref<1x16x128xf32, #tpu.memory_space<vmem>>, vector<1x16x128xf32>,
    return
  }
  func.func @transform_0(%arg0: i32, %arg1: i32) -> (i32, i32, i32) {
    %c0_i32 = arith.constant 0 : i32
    %c0_i32_0 = arith.constant 0 : i32
    return %arg0, %arg1, %c0_i32 : i32, i32, i32
  }
  func.func @transform_1(%arg0: i32, %arg1: i32) -> (i32, i32, i32) {
    %c0_i32 = arith.constant 0 : i32
    %c0_i32_0 = arith.constant 0 : i32
    return %arg0, %arg1, %c0_i32 : i32, i32, i32
  }
  func.func @transform_2(%arg0: i32, %arg1: i32) -> (i32, i32, i32) {
    %c0_i32 = arith.constant 0 : i32
    %c0_i32_0 = arith.constant 0 : i32
    %c0_i32_1 = arith.constant 0 : i32
    return %arg0, %c0_i32, %c0_i32_0 : i32, i32, i32
  }
  func.func @transform_3(%arg0: i32, %arg1: i32) -> (i32, i32) {
    %c0_i32 = arith.constant 0 : i32
    %c0_i32_0 = arith.constant 0 : i32
    %c0_i32_1 = arith.constant 0 : i32
    return %c0_i32, %c0_i32_0 : i32, i32
  }
  func.func @transform_4(%arg0: i32, %arg1: i32) -> (i32, i32) {
    %c0_i32 = arith.constant 0 : i32
    %c0_i32_0 = arith.constant 0 : i32
    %c0_i32_1 = arith.constant 0 : i32
    return %c0_i32, %c0_i32_0 : i32, i32
  }
  func.func @transform_5(%arg0: i32, %arg1: i32) -> (i32, i32, i32) {
    %c0_i32 = arith.constant 0 : i32
    %c0_i32_0 = arith.constant 0 : i32
    return %arg0, %arg1, %c0_i32 : i32, i32, i32
  }
}

</mosaic_0001>

<bundles_post_ra>
// kernel: tpu_custom_call.1
= control target key start
LH: loop header
LB: loop body
LE: loop exit
PB: predicated region body
PF: predicated region fallthrough
CT: control target
= control target key end

     0   :  { %10 = vsyncpa [#allocation3], 0  ;;  %s992_s0 = inlined_call_operand.vmem [shape: f32[2,16,16], index: 0, kind: input, shape index: {}]   ;;  %s993_s1 = inlined_call_operand.vmem [shape: f32[2,16,2], index: 1, kind: input, shape index: {}]   ;;  %s994_s2 = inlined_call_operand.vmem [shape: f32[2,1,128], index: 2, kind: input, shape index: {}]   ;;  %s995_s3 = inlined_call_operand.hbm [shape: f32[16,128], index: 3, kind: input, shape index: {}]   ;;  %s996_s4 = inlined_call_operand.vmem [shape: f32[2,128], index: 4, kind: input, shape index: {}]   ;;  %s997_s5 = inlined_call_operand.hbm [shape: f32[2,16,128], index: 5, kind: output, shape index: {}]  }
   0x1   :  { %11 = vsyncpa [#allocation4], 0 }
   0x2   :  { %13 = vsyncpa [#allocation4 + $0x1], 0  ;;  %s845_s18 = smov 0   ;;  %s847_s19 = smov 0  }
   0x3   :  { %s849_s20 = smov 0   ;;  %s851_s21 = smov 0  }
   0x4   :  { %s853_s22 = smov 0   ;;  %s855_s23 = smov 0  }
   0x5 LB: > { %s588_s24 = sadd.s32 4294967295, %s805_s23   ;;  %s589_s25 = sadd.s32 4294967294, %s805_s23   ;;  %s805_s23 = sphi %s855_s23, %s19_s23   ;;  %s801_s22 = sphi %s853_s22, %s1006_s22   ;;  %s797_s21 = sphi %s851_s21, %s1005_s21   ;;  %s793_s20 = sphi %s849_s20, %s1004_s20   ;;  %s789_s19 = sphi %s847_s19, %s1003_s19   ;;  %s785_s18 = sphi %s845_s18, %s1002_s18  }
   0x6   : > { %s31_s26 = sadd.s32 1, %s801_s22  ;;  %s164_s27 = sadd.s32 1, %s793_s20 }
   0x7   : > { %p33_p0 = scmp.ge.s32.totalorder %s31_s26, 2  ;;  %p174_p1 = scmp.ne.s32.totalorder %s793_s20, %s789_s19 }
   0x8   : > { %p175_p2 = scmp.eq.s32.totalorder %s588_s24, 1  ;;  %p180_p3 = scmp.ne.s32.totalorder %s789_s19, %s785_s18 }
   0x9   : > { %s1008_s26 = smov (%p33_p0, %s31_s26), 0  ;;  %p181_p5 = scmp.eq.s32.totalorder %s589_s25, 1 }
   0xa   : > { %p885_p4 = por %p175_p2, %p174_p1  ;;  %s159_s29 = ssub.s32 %s801_s22, %s1008_s26 }
   0xb   : > { %p590_p6 = scmp.ge.s32.totalorder %s805_s23, 1  ;;  %p162_p7 = scmp.eq.s32.totalorder %s159_s29, 0 }
   0xc   : > { %p892_p8 = por %p181_p5, %p180_p3  ;;  %p188_p9 = scmp.lt.s32.totalorder %s805_s23, 3 }
   0xd   : > { %s898_s6 = scalar_select %p162_p7, %s793_s20, %s164_s27  }
   0xe   : > { %p900_p10 = pnand %p590_p6, %p188_p9  ;;  %p904_p11 = scmp.eq.s32.totalorder %s588_s24, 0 }
   0xf   : > { %s807_s9 = smov [#allocation2]  }
  0x10   : > { %p630_p12 = pneg %p900_p10  ;;  %s200_s10 = sshll.u32 %s807_s9, 4  ;;  %s201_s10 = int_to_ptr.vmem [resolvable:$true] %s200_s10 }
  0x11   : > { %s710_s11 = scalar_lea.vmem %s201_s10, 256  ;;  %p718_p5 = scmp.lt.s32.totalorder %s201_s10, %s201_s10 }
  0x12   : > { %p631_p13 = pnand %p904_p11, %p630_p12  ;;  %p711_p1 = scmp.ne.s32.totalorder %s201_s10, %s710_s11 }
  0x13   : > { %p719_p6 = scmp.lt.s32.totalorder %s710_s11, %s710_s11 }
  0x14   : > { %p701_p0 = pneg %p631_p13 }
  0x15   : > { %p720_p7 = por %p719_p6, %p718_p5 }
  0x16   : > { %p713_p2 = pnand %p711_p1, %p701_p0 }
  0x18   : > { %p714_p3 = pneg %p713_p2 }
  0x1a   : > { %p721_p9 = pnand %p720_p7, %p714_p3 }
  0x1c   : > { %724 = shalt.err (!%p721_p9)
}
  0x1d   : > { %s808_s12 = smov 128   ;;  %s809_s13 = smov 8  }
  0x1e   : > { %633 = dma.hbm_to_vmem [thread:$0]  (!%p631_p13), %s995_s3, 256, %s201_s10, [#allocation3], %s808_s12, %s808_s12, %s809_s13  }
  0x1f   : > { %251 = sbr.rel (%p900_p10) target bundleno = 389 (0x185), region = 40 }
  0x24   : > { %776 = dma.done.wait (%p904_p11), [#allocation3], 256  }
  0x25   : > { %778 = vsyncadd (%p904_p11), [#allocation3], 4294967040  ;;  %p296_p12 = scmp.lt.s32.totalorder %s797_s21, 1  ;;  %v810_v0 = vmov 0   ;;  %v336_v2 = vld [vmem:[#allocation2 + $0x8] sm:$0xff]  ;;  %v335_v4 = vld [vmem:[#allocation2] sm:$0xff] }
  0x26   : > { %696 = vset.pattern.permute.xlu0 %v810_v0  ;;  %617 = vmatprep.subr.mxu0 %v336_v2  ;;  %v811_v5 = vmov 1   ;;  %vm352_vm0 = vcmask 130048   ;;  %s292_s12 = sand.u32 1, %s789_s19   ;;  %v600_v16 = vld [vmem:[%s996_s4] ss:$0 sm:$0xff] }
  0x27   : > { %s297_s16 = scalar_select %p296_p12, %s797_s21, 1  ;;  %618 = vmatpush3.msra.mxu0 %v336_v2  ;;  %697 = vset.pattern.permute.xlu1 %v811_v5  ;;  %v604_v22 = vld [vmem:[%s996_s4 + $0x1] ss:$0 sm:$0xff] }
  0x28   : > { %619 = vmatprep.subr.mxu0 %v335_v4  ;;  %s595_s15 = sshll.u32 %s292_s12, 4  ;;  %s947_s9 = scalar_lea.sflag [#allocation4], %s292_s12 }
  0x29   : > { %s610_s17 = sshll.u32 %s297_s16, 4  ;;  %620 = vmatpush3.msra.mxu0 %v335_v4  ;;  %s317_s11 = scalar_lea.vmem %s994_s2, %s297_s16 }
  0x2a   : > { %s313_s27 = scalar_lea.vmem %s993_s1, %s610_s17  ;;  %s303_s8 = scalar_lea.vmem %s992_s0, %s610_s17  ;;  %v603_v7 = vld [vmem:[%s317_s11] ss:$0 sm:$0xff] }
  0x2b   : > { %v319_v1 = vld [vmem:[%s313_s27] sm:$0xff]  ;;  %v320_v3 = vld [vmem:[%s313_s27 + $0x8] sm:$0xff]  ;;  %s294_s24 = scalar_lea.vmem [#allocation5], %s595_s15  ;;  %s612_s27 = sshll.u32 %s797_s21, 8 }
  0x2c   : > { %325 = vperm.xlu0 %696, %v319_v1   ;;  %339 = vperm.xlu1 %697, %v319_v1   ;;  %v321_v6 = vld [vmem:[%s303_s8] sm:$0xff]  ;;  %v322_v11 = vld [vmem:[%s303_s8 + $0x8] sm:$0xff]  ;;  %s470_s25 = sshll.u32 %s294_s24, 4  ;;  %s945_s8 = scalar_lea.hbm %s997_s5, %s612_s27  ;;  %s940_s25 = int_to_ptr.vmem [resolvable:$true] %s470_s25 }
  0x2d   : > { %s725_s10 = scalar_lea.vmem %s940_s25, 256  ;;  %s812_s21 = smov [#allocation5]  }
  0x2e   : > { %p726_p10 = scmp.ne.s32.totalorder %s940_s25, %s725_s10  ;;  %s729_s11 = sshll.u32 %s812_s21, 4  ;;  %s730_s11 = int_to_ptr.vmem [resolvable:$false] %s729_s11 }
  0x2f   : > { %s731_s13 = scalar_lea.vmem %s730_s11, 512  ;;  %p732_p0 = scmp.lt.s32.totalorder %s940_s25, %s730_s11 }
  0x30   : > { %330 = vperm.xlu0 %696, %v320_v3   ;;  %343 = vperm.xlu1 %697, %v320_v3   ;;  %p727_p11 = pnand %p726_p10, %p885_p4  ;;  %p733_p1 = scmp.lt.s32.totalorder %s731_s13, %s725_s10 }
  0x32   : > { %p728_p13 = pneg %p727_p11  ;;  %p734_p2 = por %p733_p1, %p732_p0 }
  0x34   : > { %698 = vset.pattern.permute.xlu0 %v811_v5  ;;  %p735_p3 = pnand %p734_p2, %p728_p13 }
  0xa7   : > { %v326_v8 = vpop.permute.xlu0 %325  ;;  %v340_v15 = vpop.permute.xlu1 %339 }
  0xa8   : > { %v333_v9 = vmul.f32 %v326_v8, %v321_v6  ;;  %v441_v10 = vmul.f32 %v603_v7, %v326_v8  ;;  %v350_v20 = vmul.f32 %v600_v16, %v340_v15 }
  0xaa   : > { %621 = vmatprep.mubr.msk.f32.mxu0 %vm352_vm0, %v333_v9 }
  0xab   : > { %v331_v12 = vpop.permute.xlu0 %330  ;;  %v344_v17 = vpop.permute.xlu1 %343 }
  0xac   : > { %v334_v13 = vmul.f32 %v331_v12, %v322_v11  ;;  %v442_v14 = vmul.f32 %v603_v7, %v331_v12  ;;  %v351_v18 = vmul.f32 %v600_v16, %v344_v17 }
  0xae   : > { %622 = vmatmul.mubr.msk.f32.vlgmr.msra.gmra.mxu0 %vm352_vm0, %v334_v13 }
 0x16e   : > { %v623_v19 = vpop.f32.mrf.mxu0 }
 0x16f   : > { %v431_v21 = vadd.f32 %v623_v19, %v351_v18 }
 0x170   : > { %v425_v23 = vpop.f32.mrf.mxu0 }
 0x171   : > { %v444_v24 = vadd.f32 %v442_v14, %v431_v21  ;;  %v426_v25 = vadd.f32 %v425_v23, %v350_v20 }
 0x173   : > { %v451_v26 = vadd.f32 %v604_v22, %v444_v24  ;;  %v443_v27 = vadd.f32 %v441_v10, %v426_v25 }
 0x175   : > { %453 = vst [vmem:[%s294_s24 + $0x8] sm:$0xff] %v451_v26  ;;  %v450_v28 = vadd.f32 %v604_v22, %v443_v27 }
 0x177   : > { %452 = vst [vmem:[%s294_s24] sm:$0xff] %v450_v28 }
 0x178   : > { %738 = shalt.err (!%p735_p3)
}
 0x179   : > { %s739_s12 = scalar_lea.hbm %s945_s8, 256  ;;  %s743_s16 = scalar_lea.hbm %s997_s5, 512 }
 0x17a   : > { %p740_p5 = scmp.ne.s32.totalorder %s945_s8, %s739_s12  ;;  %p744_p9 = scmp.lt.s32.totalorder %s945_s8, %s997_s5 }
 0x17b   : > { %p745_p12 = scmp.lt.s32.totalorder %s743_s16, %s739_s12 }
 0x17c   : > { %p741_p6 = pnand %p740_p5, %p885_p4 }
 0x17d   : > { %p746_p10 = por %p745_p12, %p744_p9 }
 0x17e   : > { %p742_p7 = pneg %p741_p6 }
 0x180   : > { %p747_p11 = pnand %p746_p10, %p742_p7 }
 0x182   : > { %750 = shalt.err (!%p747_p11)
}
 0x183   : > { %s813_s27 = smov 128   ;;  %s814_s29 = smov 8  }
 0x184   : > { %628 = dma.vmem_to_hbm [thread:$0]  (%p885_p4), %s940_s25, 256, %s945_s8, %s947_s9, %s813_s27, %s813_s27, %s814_s29  }
 0x185 PF: > { %p640_p13 = scmp.ge.s32.totalorder %s805_s23, 2  ;;  %s485_s7 = sand.u32 1, %s785_s18  }
 0x186   : > { %s486_s10 = scalar_lea.sflag [#allocation4], %s485_s7 }
 0x187   : > { %p635_p0 = pnand %p640_p13, %p892_p8 }
 0x189   : > { %p636_p1 = pneg %p635_p0 }
 0x18b   : > { %780 = dma.done.wait (%p636_p1), %s486_s10, 256  }
 0x18c   : > { %782 = vsyncadd (%p636_p1), %s486_s10, 4294967040  ;;  %s19_s23 = sadd.s32 1, %s805_s23   ;;  %s1002_s18 = smov %s789_s19 }
 0x18d   : > { %p16_p2 = scmp.ge.s32.totalorder %s19_s23, 4   ;;  %s1003_s19 = smov %s793_s20 }
 0x18e   : > { %s1004_s20 = smov %s898_s6  ;;  %s1005_s21 = smov %s801_s22 }
 0x18f   : > { %s1006_s22 = smov %s1008_s26  ;;  %18 = sbr.rel (!%p16_p2) target bundleno = 5 (0x5), region = 86 }
 0x194   :  { %491 = vsyncpa [#allocation3], 1 }
 0x195   :  { %493 = vsyncpa [#allocation3 + $0x1], 1 }
 0x196   :  { %494 = vsyncpa [#allocation4], 1 }
 0x197   :  { %496 = vsyncpa [#allocation4 + $0x1], 1 }

</bundles_post_ra>
